<compile_context>
chip_gen: v7x
topology: tpu7x:2x2x1
jax: 0.10.0
libtpu: 0.0.40
codegen_flags: <defaults>
</compile_context>

<pallas_src>
import functools

import jax
import jax.numpy as jnp
from jax.experimental import pallas as pl
from jax.experimental.pallas import tpu as pltpu

HIDDEN_STATE_SIZE = 32
NUM_HIDDEN_LAYER = 1
OBJECT_IN_SCENE_BIT = -1
POSITION_FEATURE_DIM = 29
POSITION_TRACK_DIM = 2
HEAD_FUSED_WIDTH = 64     # [all_fc (32) | leave_scene_fc (1) | zero pad]
OUT_WIDTH = 128           # lane-dense combined output width


# ----------------------------------------------------------------------------
# Pallas kernel: precompute + unrolled recurrence + fused batched heads
# ----------------------------------------------------------------------------
def _osp_kernel(
    x_ref,        # (S*B, 29)  time-major flattened inputs
    h0_ref,       # (B, 32)
    c0_ref,       # (B, 32)
    wih_ref,      # (29, 128)  = reorder(W_ih).T   (gate order: i, f, o, g)
    whh_ref,      # (32, 128)  = reorder(W_hh).T
    b_ref,        # (1, 128)   = reorder(b_ih + b_hh)
    whead_ref,    # (32, 64)   = [all_fc.weight.T | leave_scene_fc.weight.T | 0]
    bhead_ref,    # (1, 64)
    wpos_ref,     # (32, 128)  = position_fc.weight.T padded to 128 lanes
    bpos_ref,     # (1, 128)
    out_ref,      # OUT (S*B, 128)  lanes 0:2 = position, lane 2 = leave
    hout_ref,     # OUT (B, 32)
    cout_ref,     # OUT (B, 32)
    hs_scr,       # scratch (S*B, 32)  per-step masked hidden outputs
):
  H = HIDDEN_STATE_SIZE
  SB = x_ref.shape[0]
  B = h0_ref.shape[0]
  S = SB // B

  x_all = x_ref[...]                                   # (S*B, 29)
  whh = whh_ref[...]                                   # (32, 128)

  # --- Precompute (kept resident in vregs, off the serial critical path) ----
  # One batched MXU matmul for the input projection of every timestep, with
  # the combined LSTM bias folded in.  ~S*B x 128 f32 = a couple of vregs.
  gx = (jnp.dot(x_all, wih_ref[...], preferred_element_type=jnp.float32)
        + b_ref[...])                                  # (S*B, 128)

  # Object-in-scene bit (last feature), lane-broadcast once to the hidden
  # width; the per-step compare is a single vcmp off the h->dot(h,Whh) chain.
  bitcol = jnp.broadcast_to(
      x_all[:, POSITION_FEATURE_DIM - 1:POSITION_FEATURE_DIM], (SB, H))

  # --- Recurrence: fully unrolled, (h, c) carried in vregs ------------------
  h = h0_ref[...]                                      # (B, 32)
  c = c0_ref[...]                                      # (B, 32)

  for t in range(S):
    lo = t * B
    gates = gx[lo:lo + B, :] + jnp.dot(
        h, whh, preferred_element_type=jnp.float32)    # (B, 128)

    # Gate columns are [i, f, o, g]: sigmoid lanes 0:96, tanh lanes 96:128.
    sig = jax.nn.sigmoid(gates[:, :3 * H])
    g_g = jnp.tanh(gates[:, 3 * H:])
    i_g = sig[:, 0 * H:1 * H]
    f_g = sig[:, 1 * H:2 * H]
    o_g = sig[:, 2 * H:3 * H]

    c_new = f_g * c + i_g * g_g
    h_new = o_g * jnp.tanh(c_new)

    vm = bitcol[lo:lo + B, :] == 1.0                   # (B, 32) bool
    # Single vselect per state tensor; carry only through valid steps.
    h = jnp.where(vm, h_new, h)
    c = jnp.where(vm, c_new, c)

    # Per-step output is zeros for invalid steps (invalid_output in PyTorch).
    # Store is off the serial chain (only read after the loop).
    hs_scr[pl.ds(lo, B), :] = jnp.where(vm, h_new, 0.0)

  # --- Fused FC heads, batched over all S*B rows ----------------------------
  hs = hs_scr[...]                                     # (S*B, 32)
  h1 = (jnp.dot(hs, whead_ref[...], preferred_element_type=jnp.float32)
        + bhead_ref[...])                              # (S*B, 64)
  fc_h = jnp.maximum(h1[:, :H], 0.0)                   # all_fc + relu
  leave = jax.nn.sigmoid(h1[:, H:H + 1])               # (S*B, 1)

  pos_full = (jnp.dot(fc_h, wpos_ref[...], preferred_element_type=jnp.float32)
              + bpos_ref[...])                         # (S*B, 128), lanes 0:2

  # Lane-dense combined output: lanes 0:2 = position, lane 2 = leave.
  lane_idx = jax.lax.broadcasted_iota(jnp.int32, (SB, OUT_WIDTH), 1)
  leave_b = jnp.broadcast_to(leave, (SB, OUT_WIDTH))
  out_ref[...] = jnp.where(lane_idx == POSITION_TRACK_DIM, leave_b, pos_full)

  hout_ref[...] = h
  cout_ref[...] = c


# ----------------------------------------------------------------------------
# Wrapper (layout glue: transposes, gate reordering, head fusion, pallas_call)
# ----------------------------------------------------------------------------
def _reorder_gates(w):
  """Reorder the PyTorch LSTM gate stacking [i, f, g, o] -> [i, f, o, g]."""
  H = HIDDEN_STATE_SIZE
  return jnp.concatenate([w[:H], w[H:2 * H], w[3 * H:4 * H], w[2 * H:3 * H]],
                         axis=0)


@functools.partial(jax.jit, static_argnames=())
def object_state_prediction(x, h_t, c_t, params):
  """x: (B, S, 29) float32; h_t, c_t: (1, B, 32) float32."""
  B, S, F = x.shape
  H = HIDDEN_STATE_SIZE
  assert F == POSITION_FEATURE_DIM

  # Time-major flatten (no feature padding; kernel consumes K=29 directly).
  x_tm = jnp.transpose(x, (1, 0, 2)).astype(jnp.float32)          # (S, B, 29)
  x2 = x_tm.reshape(S * B, F)                                     # (S*B, 29)

  h0 = h_t[0].astype(jnp.float32)                                 # (B, 32)
  c0 = c_t[0].astype(jnp.float32)

  # LSTM weights: reorder gates to [i, f, o, g], transpose for row-major dot.
  wih_t = _reorder_gates(params["w_ih"]).T                        # (29, 128)
  whh_t = _reorder_gates(params["w_hh"]).T                        # (32, 128)
  b = _reorder_gates(params["b_ih"] + params["b_hh"]).reshape(1, 4 * H)

  # Fused first head matmul: [all_fc | leave_scene_fc | zero pad] -> (32, 64).
  whead = jnp.zeros((H, HEAD_FUSED_WIDTH), jnp.float32)
  whead = whead.at[:, :H].set(params["w_all"].T)
  whead = whead.at[:, H:H + 1].set(params["w_ls"].T)
  bhead = jnp.zeros((1, HEAD_FUSED_WIDTH), jnp.float32)
  bhead = bhead.at[:, :H].set(params["b_all"][None])
  bhead = bhead.at[:, H:H + 1].set(params["b_ls"][None])

  # position_fc padded to 128 lanes for the lane-dense combined output store.
  wpos_pad = jnp.zeros((H, OUT_WIDTH), jnp.float32)
  wpos_pad = wpos_pad.at[:, :POSITION_TRACK_DIM].set(params["w_pos"].T)
  bpos_pad = jnp.zeros((1, OUT_WIDTH), jnp.float32)
  bpos_pad = bpos_pad.at[:, :POSITION_TRACK_DIM].set(params["b_pos"][None])

  vmem = pl.BlockSpec(memory_space=pltpu.MemorySpace.VMEM)
  n_in = 10

  combined, h_fin, c_fin = pl.pallas_call(
      _osp_kernel,
      out_shape=(
          jax.ShapeDtypeStruct((S * B, OUT_WIDTH), jnp.float32),
          jax.ShapeDtypeStruct((B, H), jnp.float32),
          jax.ShapeDtypeStruct((B, H), jnp.float32),
      ),
      in_specs=[vmem] * n_in,
      out_specs=(vmem, vmem, vmem),
      scratch_shapes=[
          pltpu.VMEM((S * B, H), jnp.float32),   # per-step hidden outputs
      ],
  )(x2, h0, c0, wih_t, whh_t, b, whead, bhead, wpos_pad, bpos_pad)

  pos2 = combined[:, :POSITION_TRACK_DIM]                         # (S*B, 2)
  leave2 = combined[:, POSITION_TRACK_DIM:POSITION_TRACK_DIM + 1] # (S*B, 1)
  position_pred = jnp.transpose(
      pos2.reshape(S, B, POSITION_TRACK_DIM), (1, 0, 2))          # (B, S, 2)
  leave_scene_pred = jnp.transpose(
      leave2.reshape(S, B, 1), (1, 0, 2))                         # (B, S, 1)
  return ((position_pred, leave_scene_pred), (h_fin[None], c_fin[None]))


# ----------------------------------------------------------------------------
# Pure-JAX reference (for correctness check)
# ----------------------------------------------------------------------------
def reference(x, h_t, c_t, p):
  B, S, F = x.shape
  h = h_t[0]
  c = c_t[0]
  outs = []
  for t in range(S):
    xt = x[:, t, :]
    valid = xt[:, -1:] == 1.0
    gates = xt @ p["w_ih"].T + p["b_ih"] + h @ p["w_hh"].T + p["b_hh"]
    i_g, f_g, g_g, o_g = jnp.split(gates, 4, axis=-1)
    i_g, f_g, o_g = jax.nn.sigmoid(i_g), jax.nn.sigmoid(f_g), jax.nn.sigmoid(o_g)
    g_g = jnp.tanh(g_g)
    c_new = f_g * c + i_g * g_g
    h_new = o_g * jnp.tanh(c_new)
    h = jnp.where(valid, h_new, h)
    c = jnp.where(valid, c_new, c)
    outs.append(jnp.where(valid, h_new, jnp.zeros_like(h_new)))
  hs = jnp.stack(outs, axis=1)                      # (B, S, H)
  fc = jax.nn.relu(hs @ p["w_all"].T + p["b_all"])
  pos = fc @ p["w_pos"].T + p["b_pos"]
  leave = jax.nn.sigmoid(hs @ p["w_ls"].T + p["b_ls"])
  return ((pos, leave), (h[None], c[None]))


def init_params(key):
  H = HIDDEN_STATE_SIZE
  F = POSITION_FEATURE_DIM
  ks = jax.random.split(key, 10)
  bound = 1.0 / jnp.sqrt(H)

  def u(k, shape):
    return jax.random.uniform(k, shape, jnp.float32, -bound, bound)

  return {
      "w_ih": u(ks[0], (4 * H, F)),
      "w_hh": u(ks[1], (4 * H, H)),
      "b_ih": u(ks[2], (4 * H,)),
      "b_hh": u(ks[3], (4 * H,)),
      "w_all": u(ks[4], (H, H)),
      "b_all": u(ks[5], (H,)),
      "w_pos": u(ks[6], (POSITION_TRACK_DIM, H)),
      "b_pos": u(ks[7], (POSITION_TRACK_DIM,)),
      "w_ls": u(ks[8], (1, H)),
      "b_ls": u(ks[9], (1,)),
  }


if __name__ == "__main__":
  key = jax.random.PRNGKey(0)
  k_p, k_x, k_bit, k_h, k_c = jax.random.split(key, 5)

  B, S = 2, 8
  params = init_params(k_p)

  x = jax.random.normal(k_x, (B, S, POSITION_FEATURE_DIM), jnp.float32)
  # object-in-scene bit (last feature) is exactly 0.0 or 1.0
  bit = (jax.random.uniform(k_bit, (B, S)) > 0.3).astype(jnp.float32)
  x = x.at[:, :, OBJECT_IN_SCENE_BIT].set(bit)

  h_t = jax.random.normal(k_h, (NUM_HIDDEN_LAYER, B, HIDDEN_STATE_SIZE),
                          jnp.float32)
  c_t = jax.random.normal(k_c, (NUM_HIDDEN_LAYER, B, HIDDEN_STATE_SIZE),
                          jnp.float32)

  (pos, leave), (h_f, c_f) = object_state_prediction(x, h_t, c_t, params)
  jax.block_until_ready((pos, leave, h_f, c_f))

  (pos_r, leave_r), (h_r, c_r) = reference(x, h_t, c_t, params)
  assert pos.shape == (B, S, POSITION_TRACK_DIM)
  assert leave.shape == (B, S, 1)
  assert h_f.shape == (NUM_HIDDEN_LAYER, B, HIDDEN_STATE_SIZE)
  assert c_f.shape == (NUM_HIDDEN_LAYER, B, HIDDEN_STATE_SIZE)
  for a, b in ((pos, pos_r), (leave, leave_r), (h_f, h_r), (c_f, c_r)):
    assert jnp.allclose(a, b, atol=1e-5, rtol=1e-5), "mismatch vs reference"

  print("KERNEL_OK")
</pallas_src>

<mosaic_0001>
module attributes {stable_mosaic.version = 11 : i64} {
  func.func @_osp_kernel(%arg0: memref<16x29xf32, #tpu.memory_space<vmem>>, %arg1: memref<2x32xf32, #tpu.memory_space<vmem>>, %arg2: memref<2x32xf32, #tpu.memory_space<vmem>>, %arg3: memref<29x128xf32, #tpu.memory_space<vmem>>, %arg4: memref<32x128xf32, #tpu.memory_space<vmem>>, %arg5: memref<1x128xf32, #tpu.memory_space<vmem>>, %arg6: memref<32x64xf32, #tpu.memory_space<vmem>>, %arg7: memref<1x64xf32, #tpu.memory_space<vmem>>, %arg8: memref<32x128xf32, #tpu.memory_space<vmem>>, %arg9: memref<1x128xf32, #tpu.memory_space<vmem>>, %arg10: memref<16x128xf32, #tpu.memory_space<vmem>>, %arg11: memref<2x32xf32, #tpu.memory_space<vmem>>, %arg12: memref<2x32xf32, #tpu.memory_space<vmem>>, %arg13: memref<16x32xf32, #tpu.memory_space<vmem>>) attributes {dimension_semantics = [], scalar_prefetch = 0 : i64, scratch_operands = 1 : i64, tpu.core_type = #tpu.core_type<tc>} {
    %c0 = arith.constant 0 : index
    %c0_0 = arith.constant 0 : index
    %0 = vector.load %arg0[%c0, %c0_0] : memref<16x29xf32, #tpu.memory_space<vmem>>, vector<16x29xf32>
    %c0_1 = arith.constant 0 : index
    %c0_2 = arith.constant 0 : index
    %1 = vector.load %arg4[%c0_1, %c0_2] : memref<32x128xf32, #tpu.memory_space<vmem>>, vector<32x128xf32>
    %c0_3 = arith.constant 0 : index
    %c0_4 = arith.constant 0 : index
    %2 = vector.load %arg3[%c0_3, %c0_4] : memref<29x128xf32, #tpu.memory_space<vmem>>, vector<29x128xf32>
    %cst = arith.constant dense<0.000000e+00> : vector<16x128xf32>
    %3 = tpu.matmul %0, %2, %cst {dimension_numbers = #tpu.dot_dimension_numbers<[1], [0], [0], [1], [0, 0, 1, 1], [], []>} : vector<16x29xf32>, vector<29x128xf32>, vector<16x128xf32> -> vector<16x128xf32>
    %c0_5 = arith.constant 0 : index
    %c0_6 = arith.constant 0 : index
    %4 = vector.load %arg5[%c0_5, %c0_6] : memref<1x128xf32, #tpu.memory_space<vmem>>, vector<1x128xf32>
    %5 = vector.broadcast %4 : vector<1x128xf32> to vector<16x128xf32>
    %6 = arith.addf %3, %5 : vector<16x128xf32>
    %7 = vector.extract_strided_slice %0 {offsets = [0, 28], sizes = [16, 1], strides = [1, 1]} : vector<16x29xf32> to vector<16x1xf32>
    %8 = vector.shape_cast %7 : vector<16x1xf32> to vector<16x1xf32>
    %9 = vector.broadcast %8 : vector<16x1xf32> to vector<16x32xf32>
    %c0_7 = arith.constant 0 : index
    %c0_8 = arith.constant 0 : index
    %10 = vector.load %arg1[%c0_7, %c0_8] : memref<2x32xf32, #tpu.memory_space<vmem>>, vector<2x32xf32>
    %c0_9 = arith.constant 0 : index
    %c0_10 = arith.constant 0 : index
    %11 = vector.load %arg2[%c0_9, %c0_10] : memref<2x32xf32, #tpu.memory_space<vmem>>, vector<2x32xf32>
    %12 = vector.extract_strided_slice %6 {offsets = [0, 0], sizes = [2, 128], strides = [1, 1]} : vector<16x128xf32> to vector<2x128xf32>
    %cst_11 = arith.constant dense<0.000000e+00> : vector<2x128xf32>
    %13 = tpu.matmul %10, %1, %cst_11 {dimension_numbers = #tpu.dot_dimension_numbers<[1], [0], [0], [1], [0, 0, 1, 1], [], []>} : vector<2x32xf32>, vector<32x128xf32>, vector<2x128xf32> -> vector<2x128xf32>
    %14 = arith.addf %12, %13 : vector<2x128xf32>
    %15 = vector.extract_strided_slice %14 {offsets = [0, 0], sizes = [2, 96], strides = [1, 1]} : vector<2x128xf32> to vector<2x96xf32>
    %16 = arith.negf %15 : vector<2x96xf32>
    %17 = math.exp %16 : vector<2x96xf32>
    %cst_12 = arith.constant 1.000000e+00 : f32
    %18 = vector.broadcast %cst_12 : f32 to vector<2x96xf32>
    %19 = arith.addf %18, %17 : vector<2x96xf32>
    %20 = arith.divf %18, %19 : vector<2x96xf32>
    %21 = vector.extract_strided_slice %14 {offsets = [0, 96], sizes = [2, 32], strides = [1, 1]} : vector<2x128xf32> to vector<2x32xf32>
    %22 = math.tanh %21 : vector<2x32xf32>
    %23 = vector.extract_strided_slice %20 {offsets = [0, 0], sizes = [2, 32], strides = [1, 1]} : vector<2x96xf32> to vector<2x32xf32>
    %24 = vector.extract_strided_slice %20 {offsets = [0, 32], sizes = [2, 32], strides = [1, 1]} : vector<2x96xf32> to vector<2x32xf32>
    %25 = vector.extract_strided_slice %20 {offsets = [0, 64], sizes = [2, 32], strides = [1, 1]} : vector<2x96xf32> to vector<2x32xf32>
    %26 = arith.mulf %24, %11 : vector<2x32xf32>
    %27 = arith.mulf %23, %22 : vector<2x32xf32>
    %28 = arith.addf %26, %27 : vector<2x32xf32>
    %29 = math.tanh %28 : vector<2x32xf32>
    %30 = arith.mulf %25, %29 : vector<2x32xf32>
    %31 = vector.extract_strided_slice %9 {offsets = [0, 0], sizes = [2, 32], strides = [1, 1]} : vector<16x32xf32> to vector<2x32xf32>
    %cst_13 = arith.constant 1.000000e+00 : f32
    %32 = vector.broadcast %cst_13 : f32 to vector<2x32xf32>
    %33 = arith.cmpf oeq, %31, %32 : vector<2x32xf32>
    %34 = arith.select %33, %30, %10 : vector<2x32xi1>, vector<2x32xf32>
    %35 = arith.select %33, %28, %11 : vector<2x32xi1>, vector<2x32xf32>
    %cst_14 = arith.constant 0.000000e+00 : f32
    %36 = vector.broadcast %cst_14 : f32 to vector<2x32xf32>
    %37 = arith.select %33, %30, %36 : vector<2x32xi1>, vector<2x32xf32>
    %c0_15 = arith.constant 0 : index
    %c0_16 = arith.constant 0 : index
    %38 = vector.load %arg13[%c0_15, %c0_16] : memref<16x32xf32, #tpu.memory_space<vmem>>, vector<2x32xf32>
    tpu.vector_store %arg13[%c0_15, %c0_16], %37 {strides = array<i32>} : memref<16x32xf32, #tpu.memory_space<vmem>>, vector<2x32xf32>,
    %39 = vector.extract_strided_slice %6 {offsets = [2, 0], sizes = [2, 128], strides = [1, 1]} : vector<16x128xf32> to vector<2x128xf32>
    %cst_17 = arith.constant dense<0.000000e+00> : vector<2x128xf32>
    %40 = tpu.matmul %34, %1, %cst_17 {dimension_numbers = #tpu.dot_dimension_numbers<[1], [0], [0], [1], [0, 0, 1, 1], [], []>} : vector<2x32xf32>, vector<32x128xf32>, vector<2x128xf32> -> vector<2x128xf32>
    %41 = arith.addf %39, %40 : vector<2x128xf32>
    %42 = vector.extract_strided_slice %41 {offsets = [0, 0], sizes = [2, 96], strides = [1, 1]} : vector<2x128xf32> to vector<2x96xf32>
    %43 = arith.negf %42 : vector<2x96xf32>
    %44 = math.exp %43 : vector<2x96xf32>
    %cst_18 = arith.constant 1.000000e+00 : f32
    %45 = vector.broadcast %cst_18 : f32 to vector<2x96xf32>
    %46 = arith.addf %45, %44 : vector<2x96xf32>
    %47 = arith.divf %45, %46 : vector<2x96xf32>
    %48 = vector.extract_strided_slice %41 {offsets = [0, 96], sizes = [2, 32], strides = [1, 1]} : vector<2x128xf32> to vector<2x32xf32>
    %49 = math.tanh %48 : vector<2x32xf32>
    %50 = vector.extract_strided_slice %47 {offsets = [0, 0], sizes = [2, 32], strides = [1, 1]} : vector<2x96xf32> to vector<2x32xf32>
    %51 = vector.extract_strided_slice %47 {offsets = [0, 32], sizes = [2, 32], strides = [1, 1]} : vector<2x96xf32> to vector<2x32xf32>
    %52 = vector.extract_strided_slice %47 {offsets = [0, 64], sizes = [2, 32], strides = [1, 1]} : vector<2x96xf32> to vector<2x32xf32>
    %53 = arith.mulf %51, %35 : vector<2x32xf32>
    %54 = arith.mulf %50, %49 : vector<2x32xf32>
    %55 = arith.addf %53, %54 : vector<2x32xf32>
    %56 = math.tanh %55 : vector<2x32xf32>
    %57 = arith.mulf %52, %56 : vector<2x32xf32>
    %58 = vector.extract_strided_slice %9 {offsets = [2, 0], sizes = [2, 32], strides = [1, 1]} : vector<16x32xf32> to vector<2x32xf32>
    %cst_19 = arith.constant 1.000000e+00 : f32
    %59 = vector.broadcast %cst_19 : f32 to vector<2x32xf32>
    %60 = arith.cmpf oeq, %58, %59 : vector<2x32xf32>
    %61 = arith.select %60, %57, %34 : vector<2x32xi1>, vector<2x32xf32>
    %62 = arith.select %60, %55, %35 : vector<2x32xi1>, vector<2x32xf32>
    %cst_20 = arith.constant 0.000000e+00 : f32
    %63 = vector.broadcast %cst_20 : f32 to vector<2x32xf32>
    %64 = arith.select %60, %57, %63 : vector<2x32xi1>, vector<2x32xf32>
    %c2 = arith.constant 2 : index
    %c0_21 = arith.constant 0 : index
    %65 = vector.load %arg13[%c2, %c0_21] : memref<16x32xf32, #tpu.memory_space<vmem>>, vector<2x32xf32>
    tpu.vector_store %arg13[%c2, %c0_21], %64 {strides = array<i32>} : memref<16x32xf32, #tpu.memory_space<vmem>>, vector<2x32xf32>,
    %66 = vector.extract_strided_slice %6 {offsets = [4, 0], sizes = [2, 128], strides = [1, 1]} : vector<16x128xf32> to vector<2x128xf32>
    %cst_22 = arith.constant dense<0.000000e+00> : vector<2x128xf32>
    %67 = tpu.matmul %61, %1, %cst_22 {dimension_numbers = #tpu.dot_dimension_numbers<[1], [0], [0], [1], [0, 0, 1, 1], [], []>} : vector<2x32xf32>, vector<32x128xf32>, vector<2x128xf32> -> vector<2x128xf32>
    %68 = arith.addf %66, %67 : vector<2x128xf32>
    %69 = vector.extract_strided_slice %68 {offsets = [0, 0], sizes = [2, 96], strides = [1, 1]} : vector<2x128xf32> to vector<2x96xf32>
    %70 = arith.negf %69 : vector<2x96xf32>
    %71 = math.exp %70 : vector<2x96xf32>
    %cst_23 = arith.constant 1.000000e+00 : f32
    %72 = vector.broadcast %cst_23 : f32 to vector<2x96xf32>
    %73 = arith.addf %72, %71 : vector<2x96xf32>
    %74 = arith.divf %72, %73 : vector<2x96xf32>
    %75 = vector.extract_strided_slice %68 {offsets = [0, 96], sizes = [2, 32], strides = [1, 1]} : vector<2x128xf32> to vector<2x32xf32>
    %76 = math.tanh %75 : vector<2x32xf32>
    %77 = vector.extract_strided_slice %74 {offsets = [0, 0], sizes = [2, 32], strides = [1, 1]} : vector<2x96xf32> to vector<2x32xf32>
    %78 = vector.extract_strided_slice %74 {offsets = [0, 32], sizes = [2, 32], strides = [1, 1]} : vector<2x96xf32> to vector<2x32xf32>
    %79 = vector.extract_strided_slice %74 {offsets = [0, 64], sizes = [2, 32], strides = [1, 1]} : vector<2x96xf32> to vector<2x32xf32>
    %80 = arith.mulf %78, %62 : vector<2x32xf32>
    %81 = arith.mulf %77, %76 : vector<2x32xf32>
    %82 = arith.addf %80, %81 : vector<2x32xf32>
    %83 = math.tanh %82 : vector<2x32xf32>
    %84 = arith.mulf %79, %83 : vector<2x32xf32>
    %85 = vector.extract_strided_slice %9 {offsets = [4, 0], sizes = [2, 32], strides = [1, 1]} : vector<16x32xf32> to vector<2x32xf32>
    %cst_24 = arith.constant 1.000000e+00 : f32
    %86 = vector.broadcast %cst_24 : f32 to vector<2x32xf32>
    %87 = arith.cmpf oeq, %85, %86 : vector<2x32xf32>
    %88 = arith.select %87, %84, %61 : vector<2x32xi1>, vector<2x32xf32>
    %89 = arith.select %87, %82, %62 : vector<2x32xi1>, vector<2x32xf32>
    %cst_25 = arith.constant 0.000000e+00 : f32
    %90 = vector.broadcast %cst_25 : f32 to vector<2x32xf32>
    %91 = arith.select %87, %84, %90 : vector<2x32xi1>, vector<2x32xf32>
    %c4 = arith.constant 4 : index
    %c0_26 = arith.constant 0 : index
    %92 = vector.load %arg13[%c4, %c0_26] : memref<16x32xf32, #tpu.memory_space<vmem>>, vector<2x32xf32>
    tpu.vector_store %arg13[%c4, %c0_26], %91 {strides = array<i32>} : memref<16x32xf32, #tpu.memory_space<vmem>>, vector<2x32xf32>,
    %93 = vector.extract_strided_slice %6 {offsets = [6, 0], sizes = [2, 128], strides = [1, 1]} : vector<16x128xf32> to vector<2x128xf32>
    %cst_27 = arith.constant dense<0.000000e+00> : vector<2x128xf32>
    %94 = tpu.matmul %88, %1, %cst_27 {dimension_numbers = #tpu.dot_dimension_numbers<[1], [0], [0], [1], [0, 0, 1, 1], [], []>} : vector<2x32xf32>, vector<32x128xf32>, vector<2x128xf32> -> vector<2x128xf32>
    %95 = arith.addf %93, %94 : vector<2x128xf32>
    %96 = vector.extract_strided_slice %95 {offsets = [0, 0], sizes = [2, 96], strides = [1, 1]} : vector<2x128xf32> to vector<2x96xf32>
    %97 = arith.negf %96 : vector<2x96xf32>
    %98 = math.exp %97 : vector<2x96xf32>
    %cst_28 = arith.constant 1.000000e+00 : f32
    %99 = vector.broadcast %cst_28 : f32 to vector<2x96xf32>
    %100 = arith.addf %99, %98 : vector<2x96xf32>
    %101 = arith.divf %99, %100 : vector<2x96xf32>
    %102 = vector.extract_strided_slice %95 {offsets = [0, 96], sizes = [2, 32], strides = [1, 1]} : vector<2x128xf32> to vector<2x32xf32>
    %103 = math.tanh %102 : vector<2x32xf32>
    %104 = vector.extract_strided_slice %101 {offsets = [0, 0], sizes = [2, 32], strides = [1, 1]} : vector<2x96xf32> to vector<2x32xf32>
    %105 = vector.extract_strided_slice %101 {offsets = [0, 32], sizes = [2, 32], strides = [1, 1]} : vector<2x96xf32> to vector<2x32xf32>
    %106 = vector.extract_strided_slice %101 {offsets = [0, 64], sizes = [2, 32], strides = [1, 1]} : vector<2x96xf32> to vector<2x32xf32>
    %107 = arith.mulf %105, %89 : vector<2x32xf32>
    %108 = arith.mulf %104, %103 : vector<2x32xf32>
    %109 = arith.addf %107, %108 : vector<2x32xf32>
    %110 = math.tanh %109 : vector<2x32xf32>
    %111 = arith.mulf %106, %110 : vector<2x32xf32>
    %112 = vector.extract_strided_slice %9 {offsets = [6, 0], sizes = [2, 32], strides = [1, 1]} : vector<16x32xf32> to vector<2x32xf32>
    %cst_29 = arith.constant 1.000000e+00 : f32
    %113 = vector.broadcast %cst_29 : f32 to vector<2x32xf32>
    %114 = arith.cmpf oeq, %112, %113 : vector<2x32xf32>
    %115 = arith.select %114, %111, %88 : vector<2x32xi1>, vector<2x32xf32>
    %116 = arith.select %114, %109, %89 : vector<2x32xi1>, vector<2x32xf32>
    %cst_30 = arith.constant 0.000000e+00 : f32
    %117 = vector.broadcast %cst_30 : f32 to vector<2x32xf32>
    %118 = arith.select %114, %111, %117 : vector<2x32xi1>, vector<2x32xf32>
    %c6 = arith.constant 6 : index
    %c0_31 = arith.constant 0 : index
    %119 = vector.load %arg13[%c6, %c0_31] : memref<16x32xf32, #tpu.memory_space<vmem>>, vector<2x32xf32>
    tpu.vector_store %arg13[%c6, %c0_31], %118 {strides = array<i32>} : memref<16x32xf32, #tpu.memory_space<vmem>>, vector<2x32xf32>,
    %120 = vector.extract_strided_slice %6 {offsets = [8, 0], sizes = [2, 128], strides = [1, 1]} : vector<16x128xf32> to vector<2x128xf32>
    %cst_32 = arith.constant dense<0.000000e+00> : vector<2x128xf32>
    %121 = tpu.matmul %115, %1, %cst_32 {dimension_numbers = #tpu.dot_dimension_numbers<[1], [0], [0], [1], [0, 0, 1, 1], [], []>} : vector<2x32xf32>, vector<32x128xf32>, vector<2x128xf32> -> vector<2x128xf32>
    %122 = arith.addf %120, %121 : vector<2x128xf32>
    %123 = vector.extract_strided_slice %122 {offsets = [0, 0], sizes = [2, 96], strides = [1, 1]} : vector<2x128xf32> to vector<2x96xf32>
    %124 = arith.negf %123 : vector<2x96xf32>
    %125 = math.exp %124 : vector<2x96xf32>
    %cst_33 = arith.constant 1.000000e+00 : f32
    %126 = vector.broadcast %cst_33 : f32 to vector<2x96xf32>
    %127 = arith.addf %126, %125 : vector<2x96xf32>
    %128 = arith.divf %126, %127 : vector<2x96xf32>
    %129 = vector.extract_strided_slice %122 {offsets = [0, 96], sizes = [2, 32], strides = [1, 1]} : vector<2x128xf32> to vector<2x32xf32>
    %130 = math.tanh %129 : vector<2x32xf32>
    %131 = vector.extract_strided_slice %128 {offsets = [0, 0], sizes = [2, 32], strides = [1, 1]} : vector<2x96xf32> to vector<2x32xf32>
    %132 = vector.extract_strided_slice %128 {offsets = [0, 32], sizes = [2, 32], strides = [1, 1]} : vector<2x96xf32> to vector<2x32xf32>
    %133 = vector.extract_strided_slice %128 {offsets = [0, 64], sizes = [2, 32], strides = [1, 1]} : vector<2x96xf32> to vector<2x32xf32>
    %134 = arith.mulf %132, %116 : vector<2x32xf32>
    %135 = arith.mulf %131, %130 : vector<2x32xf32>
    %136 = arith.addf %134, %135 : vector<2x32xf32>
    %137 = math.tanh %136 : vector<2x32xf32>
    %138 = arith.mulf %133, %137 : vector<2x32xf32>
    %139 = vector.extract_strided_slice %9 {offsets = [8, 0], sizes = [2, 32], strides = [1, 1]} : vector<16x32xf32> to vector<2x32xf32>
    %cst_34 = arith.constant 1.000000e+00 : f32
    %140 = vector.broadcast %cst_34 : f32 to vector<2x32xf32>
    %141 = arith.cmpf oeq, %139, %140 : vector<2x32xf32>
    %142 = arith.select %141, %138, %115 : vector<2x32xi1>, vector<2x32xf32>
    %143 = arith.select %141, %136, %116 : vector<2x32xi1>, vector<2x32xf32>
    %cst_35 = arith.constant 0.000000e+00 : f32
    %144 = vector.broadcast %cst_35 : f32 to vector<2x32xf32>
    %145 = arith.select %141, %138, %144 : vector<2x32xi1>, vector<2x32xf32>
    %c8 = arith.constant 8 : index
    %c0_36 = arith.constant 0 : index
    %146 = vector.load %arg13[%c8, %c0_36] : memref<16x32xf32, #tpu.memory_space<vmem>>, vector<2x32xf32>
    tpu.vector_store %arg13[%c8, %c0_36], %145 {strides = array<i32>} : memref<16x32xf32, #tpu.memory_space<vmem>>, vector<2x32xf32>,
    %147 = vector.extract_strided_slice %6 {offsets = [10, 0], sizes = [2, 128], strides = [1, 1]} : vector<16x128xf32> to vector<2x128xf32>
    %cst_37 = arith.constant dense<0.000000e+00> : vector<2x128xf32>
    %148 = tpu.matmul %142, %1, %cst_37 {dimension_numbers = #tpu.dot_dimension_numbers<[1], [0], [0], [1], [0, 0, 1, 1], [], []>} : vector<2x32xf32>, vector<32x128xf32>, vector<2x128xf32> -> vector<2x128xf32>
    %149 = arith.addf %147, %148 : vector<2x128xf32>
    %150 = vector.extract_strided_slice %149 {offsets = [0, 0], sizes = [2, 96], strides = [1, 1]} : vector<2x128xf32> to vector<2x96xf32>
    %151 = arith.negf %150 : vector<2x96xf32>
    %152 = math.exp %151 : vector<2x96xf32>
    %cst_38 = arith.constant 1.000000e+00 : f32
    %153 = vector.broadcast %cst_38 : f32 to vector<2x96xf32>
    %154 = arith.addf %153, %152 : vector<2x96xf32>
    %155 = arith.divf %153, %154 : vector<2x96xf32>
    %156 = vector.extract_strided_slice %149 {offsets = [0, 96], sizes = [2, 32], strides = [1, 1]} : vector<2x128xf32> to vector<2x32xf32>
    %157 = math.tanh %156 : vector<2x32xf32>
    %158 = vector.extract_strided_slice %155 {offsets = [0, 0], sizes = [2, 32], strides = [1, 1]} : vector<2x96xf32> to vector<2x32xf32>
    %159 = vector.extract_strided_slice %155 {offsets = [0, 32], sizes = [2, 32], strides = [1, 1]} : vector<2x96xf32> to vector<2x32xf32>
    %160 = vector.extract_strided_slice %155 {offsets = [0, 64], sizes = [2, 32], strides = [1, 1]} : vector<2x96xf32> to vector<2x32xf32>
    %161 = arith.mulf %159, %143 : vector<2x32xf32>
    %162 = arith.mulf %158, %157 : vector<2x32xf32>
    %163 = arith.addf %161, %162 : vector<2x32xf32>
    %164 = math.tanh %163 : vector<2x32xf32>
    %165 = arith.mulf %160, %164 : vector<2x32xf32>
    %166 = vector.extract_strided_slice %9 {offsets = [10, 0], sizes = [2, 32], strides = [1, 1]} : vector<16x32xf32> to vector<2x32xf32>
    %cst_39 = arith.constant 1.000000e+00 : f32
    %167 = vector.broadcast %cst_39 : f32 to vector<2x32xf32>
    %168 = arith.cmpf oeq, %166, %167 : vector<2x32xf32>
    %169 = arith.select %168, %165, %142 : vector<2x32xi1>, vector<2x32xf32>
    %170 = arith.select %168, %163, %143 : vector<2x32xi1>, vector<2x32xf32>
    %cst_40 = arith.constant 0.000000e+00 : f32
    %171 = vector.broadcast %cst_40 : f32 to vector<2x32xf32>
    %172 = arith.select %168, %165, %171 : vector<2x32xi1>, vector<2x32xf32>
    %c10 = arith.constant 10 : index
    %c0_41 = arith.constant 0 : index
    %173 = vector.load %arg13[%c10, %c0_41] : memref<16x32xf32, #tpu.memory_space<vmem>>, vector<2x32xf32>
    tpu.vector_store %arg13[%c10, %c0_41], %172 {strides = array<i32>} : memref<16x32xf32, #tpu.memory_space<vmem>>, vector<2x32xf32>,
    %174 = vector.extract_strided_slice %6 {offsets = [12, 0], sizes = [2, 128], strides = [1, 1]} : vector<16x128xf32> to vector<2x128xf32>
    %cst_42 = arith.constant dense<0.000000e+00> : vector<2x128xf32>
    %175 = tpu.matmul %169, %1, %cst_42 {dimension_numbers = #tpu.dot_dimension_numbers<[1], [0], [0], [1], [0, 0, 1, 1], [], []>} : vector<2x32xf32>, vector<32x128xf32>, vector<2x128xf32> -> vector<2x128xf32>
    %176 = arith.addf %174, %175 : vector<2x128xf32>
    %177 = vector.extract_strided_slice %176 {offsets = [0, 0], sizes = [2, 96], strides = [1, 1]} : vector<2x128xf32> to vector<2x96xf32>
    %178 = arith.negf %177 : vector<2x96xf32>
    %179 = math.exp %178 : vector<2x96xf32>
    %cst_43 = arith.constant 1.000000e+00 : f32
    %180 = vector.broadcast %cst_43 : f32 to vector<2x96xf32>
    %181 = arith.addf %180, %179 : vector<2x96xf32>
    %182 = arith.divf %180, %181 : vector<2x96xf32>
    %183 = vector.extract_strided_slice %176 {offsets = [0, 96], sizes = [2, 32], strides = [1, 1]} : vector<2x128xf32> to vector<2x32xf32>
    %184 = math.tanh %183 : vector<2x32xf32>
    %185 = vector.extract_strided_slice %182 {offsets = [0, 0], sizes = [2, 32], strides = [1, 1]} : vector<2x96xf32> to vector<2x32xf32>
    %186 = vector.extract_strided_slice %182 {offsets = [0, 32], sizes = [2, 32], strides = [1, 1]} : vector<2x96xf32> to vector<2x32xf32>
    %187 = vector.extract_strided_slice %182 {offsets = [0, 64], sizes = [2, 32], strides = [1, 1]} : vector<2x96xf32> to vector<2x32xf32>
    %188 = arith.mulf %186, %170 : vector<2x32xf32>
    %189 = arith.mulf %185, %184 : vector<2x32xf32>
    %190 = arith.addf %188, %189 : vector<2x32xf32>
    %191 = math.tanh %190 : vector<2x32xf32>
    %192 = arith.mulf %187, %191 : vector<2x32xf32>
    %193 = vector.extract_strided_slice %9 {offsets = [12, 0], sizes = [2, 32], strides = [1, 1]} : vector<16x32xf32> to vector<2x32xf32>
    %cst_44 = arith.constant 1.000000e+00 : f32
    %194 = vector.broadcast %cst_44 : f32 to vector<2x32xf32>
    %195 = arith.cmpf oeq, %193, %194 : vector<2x32xf32>
    %196 = arith.select %195, %192, %169 : vector<2x32xi1>, vector<2x32xf32>
    %197 = arith.select %195, %190, %170 : vector<2x32xi1>, vector<2x32xf32>
    %cst_45 = arith.constant 0.000000e+00 : f32
    %198 = vector.broadcast %cst_45 : f32 to vector<2x32xf32>
    %199 = arith.select %195, %192, %198 : vector<2x32xi1>, vector<2x32xf32>
    %c12 = arith.constant 12 : index
    %c0_46 = arith.constant 0 : index
    %200 = vector.load %arg13[%c12, %c0_46] : memref<16x32xf32, #tpu.memory_space<vmem>>, vector<2x32xf32>
    tpu.vector_store %arg13[%c12, %c0_46], %199 {strides = array<i32>} : memref<16x32xf32, #tpu.memory_space<vmem>>, vector<2x32xf32>,
    %201 = vector.extract_strided_slice %6 {offsets = [14, 0], sizes = [2, 128], strides = [1, 1]} : vector<16x128xf32> to vector<2x128xf32>
    %cst_47 = arith.constant dense<0.000000e+00> : vector<2x128xf32>
    %202 = tpu.matmul %196, %1, %cst_47 {dimension_numbers = #tpu.dot_dimension_numbers<[1], [0], [0], [1], [0, 0, 1, 1], [], []>} : vector<2x32xf32>, vector<32x128xf32>, vector<2x128xf32> -> vector<2x128xf32>
    %203 = arith.addf %201, %202 : vector<2x128xf32>
    %204 = vector.extract_strided_slice %203 {offsets = [0, 0], sizes = [2, 96], strides = [1, 1]} : vector<2x128xf32> to vector<2x96xf32>
    %205 = arith.negf %204 : vector<2x96xf32>
    %206 = math.exp %205 : vector<2x96xf32>
    %cst_48 = arith.constant 1.000000e+00 : f32
    %207 = vector.broadcast %cst_48 : f32 to vector<2x96xf32>
    %208 = arith.addf %207, %206 : vector<2x96xf32>
    %209 = arith.divf %207, %208 : vector<2x96xf32>
    %210 = vector.extract_strided_slice %203 {offsets = [0, 96], sizes = [2, 32], strides = [1, 1]} : vector<2x128xf32> to vector<2x32xf32>
    %211 = math.tanh %210 : vector<2x32xf32>
    %212 = vector.extract_strided_slice %209 {offsets = [0, 0], sizes = [2, 32], strides = [1, 1]} : vector<2x96xf32> to vector<2x32xf32>
    %213 = vector.extract_strided_slice %209 {offsets = [0, 32], sizes = [2, 32], strides = [1, 1]} : vector<2x96xf32> to vector<2x32xf32>
    %214 = vector.extract_strided_slice %209 {offsets = [0, 64], sizes = [2, 32], strides = [1, 1]} : vector<2x96xf32> to vector<2x32xf32>
    %215 = arith.mulf %213, %197 : vector<2x32xf32>
    %216 = arith.mulf %212, %211 : vector<2x32xf32>
    %217 = arith.addf %215, %216 : vector<2x32xf32>
    %218 = math.tanh %217 : vector<2x32xf32>
    %219 = arith.mulf %214, %218 : vector<2x32xf32>
    %220 = vector.extract_strided_slice %9 {offsets = [14, 0], sizes = [2, 32], strides = [1, 1]} : vector<16x32xf32> to vector<2x32xf32>
    %cst_49 = arith.constant 1.000000e+00 : f32
    %221 = vector.broadcast %cst_49 : f32 to vector<2x32xf32>
    %222 = arith.cmpf oeq, %220, %221 : vector<2x32xf32>
    %223 = arith.select %222, %219, %196 : vector<2x32xi1>, vector<2x32xf32>
    %224 = arith.select %222, %217, %197 : vector<2x32xi1>, vector<2x32xf32>
    %cst_50 = arith.constant 0.000000e+00 : f32
    %225 = vector.broadcast %cst_50 : f32 to vector<2x32xf32>
    %226 = arith.select %222, %219, %225 : vector<2x32xi1>, vector<2x32xf32>
    %c14 = arith.constant 14 : index
    %c0_51 = arith.constant 0 : index
    %227 = vector.load %arg13[%c14, %c0_51] : memref<16x32xf32, #tpu.memory_space<vmem>>, vector<2x32xf32>
    tpu.vector_store %arg13[%c14, %c0_51], %226 {strides = array<i32>} : memref<16x32xf32, #tpu.memory_space<vmem>>, vector<2x32xf32>,
    %c0_52 = arith.constant 0 : index
    %c0_53 = arith.constant 0 : index
    %228 = vector.load %arg13[%c0_52, %c0_53] : memref<16x32xf32, #tpu.memory_space<vmem>>, vector<16x32xf32>
    %c0_54 = arith.constant 0 : index
    %c0_55 = arith.constant 0 : index
    %229 = vector.load %arg6[%c0_54, %c0_55] : memref<32x64xf32, #tpu.memory_space<vmem>>, vector<32x64xf32>
    %cst_56 = arith.constant dense<0.000000e+00> : vector<16x64xf32>
    %230 = tpu.matmul %228, %229, %cst_56 {dimension_numbers = #tpu.dot_dimension_numbers<[1], [0], [0], [1], [0, 0, 1, 1], [], []>} : vector<16x32xf32>, vector<32x64xf32>, vector<16x64xf32> -> vector<16x64xf32>
    %c0_57 = arith.constant 0 : index
    %c0_58 = arith.constant 0 : index
    %231 = vector.load %arg7[%c0_57, %c0_58] : memref<1x64xf32, #tpu.memory_space<vmem>>, vector<1x64xf32>
    %232 = vector.broadcast %231 : vector<1x64xf32> to vector<16x64xf32>
    %233 = arith.addf %230, %232 : vector<16x64xf32>
    %234 = vector.extract_strided_slice %233 {offsets = [0, 0], sizes = [16, 32], strides = [1, 1]} : vector<16x64xf32> to vector<16x32xf32>
    %cst_59 = arith.constant 0.000000e+00 : f32
    %235 = vector.broadcast %cst_59 : f32 to vector<16x32xf32>
    %236 = arith.maximumf %234, %235 : vector<16x32xf32>
    %237 = vector.extract_strided_slice %233 {offsets = [0, 32], sizes = [16, 1], strides = [1, 1]} : vector<16x64xf32> to vector<16x1xf32>
    %238 = arith.negf %237 : vector<16x1xf32>
    %239 = math.exp %238 : vector<16x1xf32>
    %cst_60 = arith.constant 1.000000e+00 : f32
    %240 = vector.broadcast %cst_60 : f32 to vector<16x1xf32>
    %241 = arith.addf %240, %239 : vector<16x1xf32>
    %242 = arith.divf %240, %241 : vector<16x1xf32>
    %c0_61 = arith.constant 0 : index
    %c0_62 = arith.constant 0 : index
    %243 = vector.load %arg8[%c0_61, %c0_62] : memref<32x128xf32, #tpu.memory_space<vmem>>, vector<32x128xf32>
    %cst_63 = arith.constant dense<0.000000e+00> : vector<16x128xf32>
    %244 = tpu.matmul %236, %243, %cst_63 {dimension_numbers = #tpu.dot_dimension_numbers<[1], [0], [0], [1], [0, 0, 1, 1], [], []>} : vector<16x32xf32>, vector<32x128xf32>, vector<16x128xf32> -> vector<16x128xf32>
    %c0_64 = arith.constant 0 : index
    %c0_65 = arith.constant 0 : index
    %245 = vector.load %arg9[%c0_64, %c0_65] : memref<1x128xf32, #tpu.memory_space<vmem>>, vector<1x128xf32>
    %246 = vector.broadcast %245 : vector<1x128xf32> to vector<16x128xf32>
    %247 = arith.addf %244, %246 : vector<16x128xf32>
    %248 = tpu.iota {dimensions = array<i32: 1>} : vector<16x128xi32>
    %249 = vector.shape_cast %242 : vector<16x1xf32> to vector<16x1xf32>
    %250 = vector.broadcast %249 : vector<16x1xf32> to vector<16x128xf32>
    %c2_i32 = arith.constant 2 : i32
    %251 = vector.broadcast %c2_i32 : i32 to vector<16x128xi32>
    %252 = arith.cmpi eq, %248, %251 : vector<16x128xi32>
    %253 = arith.select %252, %250, %247 : vector<16x128xi1>, vector<16x128xf32>
    %c0_66 = arith.constant 0 : index
    %c0_67 = arith.constant 0 : index
    %254 = vector.load %arg10[%c0_66, %c0_67] : memref<16x128xf32, #tpu.memory_space<vmem>>, vector<16x128xf32>
    tpu.vector_store %arg10[%c0_66, %c0_67], %253 {strides = array<i32>} : memref<16x128xf32, #tpu.memory_space<vmem>>, vector<16x128xf32>,
    %c0_68 = arith.constant 0 : index
    %c0_69 = arith.constant 0 : index
    %255 = vector.load %arg11[%c0_68, %c0_69] : memref<2x32xf32, #tpu.memory_space<vmem>>, vector<2x32xf32>
    tpu.vector_store %arg11[%c0_68, %c0_69], %223 {strides = array<i32>} : memref<2x32xf32, #tpu.memory_space<vmem>>, vector<2x32xf32>,
    %c0_70 = arith.constant 0 : index
    %c0_71 = arith.constant 0 : index
    %256 = vector.load %arg12[%c0_70, %c0_71] : memref<2x32xf32, #tpu.memory_space<vmem>>, vector<2x32xf32>
    tpu.vector_store %arg12[%c0_70, %c0_71], %224 {strides = array<i32>} : memref<2x32xf32, #tpu.memory_space<vmem>>, vector<2x32xf32>,
    return
  }
}

</mosaic_0001>

<bundles_post_ra>
// kernel: object_state_prediction.1
= control target key start
LH: loop header
LB: loop body
LE: loop exit
PB: predicated region body
PF: predicated region fallthrough
CT: control target
= control target key end

     0   :  { %18 = vsyncpa [#allocation4], 0  ;;  %vm64_vm0 = vcmask 1044480   ;;  %v1760_v4 = vmov 0.0|0.0   ;;  %vm57_vm1 = vcmask 236544   ;;  %vm1761_vm2 = vmmov 1   ;;  %s2156_s0 = inlined_call_operand.vmem [shape: f32[16,29], index: 0, kind: input, shape index: {}]   ;;  %s2157_s1 = inlined_call_operand.vmem [shape: f32[2,32], index: 1, kind: input, shape index: {}]   ;;  %s2158_s2 = inlined_call_operand.vmem [shape: f32[2,32], index: 2, kind: input, shape index: {}]   ;;  %s2159_s3 = inlined_call_operand.vmem [shape: f32[29,128], index: 3, kind: input, shape index: {}]   ;;  %s2160_s4 = inlined_call_operand.vmem [shape: f32[32,128], index: 4, kind: input, shape index: {}]   ;;  %s2161_s5 = inlined_call_operand.vmem [shape: f32[1,128], index: 5, kind: input, shape index: {}]   ;;  %s2162_s6 = inlined_call_operand.vmem [shape: f32[32,64], index: 6, kind: input, shape index: {}]   ;;  %s2163_s7 = inlined_call_operand.vmem [shape: f32[1,64], index: 7, kind: input, shape index: {}]   ;;  %s2164_s8 = inlined_call_operand.vmem [shape: f32[32,128], index: 8, kind: input, shape index: {}]   ;;  %s2165_s9 = inlined_call_operand.vmem [shape: f32[1,128], index: 9, kind: input, shape index: {}]   ;;  %s2166_s10 = inlined_call_operand.vmem [shape: f32[16,128], index: 10, kind: output, shape index: {0}]   ;;  %s2167_s11 = inlined_call_operand.hbm [shape: f32[2,32], index: 11, kind: output, shape index: {1}]   ;;  %s2168_s12 = inlined_call_operand.hbm [shape: f32[2,32], index: 12, kind: output, shape index: {2}]  }
   0x1   :  { %v46_v0 = vld [vmem:[%s2159_s3] sm:$0xff]  ;;  %v47_v1 = vld [vmem:[%s2159_s3 + $0x8] sm:$0xff]  ;;  %1562 = vmatprep.subr.bf16.mxu1 %v1760_v4  ;;  %v48_v6 = vld [vmem:[%s2159_s3 + $0x10] sm:$0xff] }
   0x2   :  { %v42_v2 = vld [vmem:[%s2160_s4] sm:$0xff]  ;;  %v1552_v3 = vpack.c.bf16 %v47_v1, %v46_v0  ;;  %v43_v5 = vld [vmem:[%s2160_s4 + $0x8] sm:$0xff]  ;;  %v49_v7 = vld [vmem:[%s2159_s3 + $0x18] sm:$0x1f] }
   0x3   :  { %v1855_v8 = vpack.c.bf16 %v43_v5, %v42_v2  ;;  %v1556_v9 = vpack.c.bf16 %v49_v7, %v48_v6  ;;  %vm1557_vm3 = vmpackc.low %vm64_vm0, %vm1761_vm2  ;;  %v40_v10 = vld [vmem:[%s2156_s0] sm:$0xff]  ;;  %v44_v11 = vld [vmem:[%s2160_s4 + $0x10] sm:$0xff] }
   0x4   :  { %1553 = vmatprep.subr.bf16.mxu0 %v1552_v3  ;;  %1439 = vmatprep.mubr.msk.f32.mxu0 %vm57_vm1, %v40_v10  ;;  %v45_v12 = vld [vmem:[%s2160_s4 + $0x18] sm:$0xff] }
   0x5   :  { %1555 = vmatpush3.bf16.msra.mxu0 %v1552_v3  ;;  %1564 = vmatpush3.bf16.msra.mxu1 %v1855_v8  ;;  %v1868_v13 = vpack.c.bf16 %v45_v12, %v44_v11 }
   0x6   :  { %19 = vsyncpa [#allocation6], 0  ;;  %1558 = vmatprep.subr.msk.bf16.mxu0 %vm1557_vm3, %v1556_v9  ;;  %1565 = vmatprep.subr.bf16.mxu1 %v1760_v4  ;;  %vm1762_vm4 = vmmov 0   ;;  %v1763_v14 = vmov 0.0   ;;  %v1877_v15 = vld [vmem:[%s2156_s0 + $0x8] sm:$0xff]  ;;  %vm145_vm5 = vcmask 261120  }
   0x7   :  { %1450 = vmatprep.mubr.msk.f32.mxu1 %vm1762_vm4, %v1763_v14  ;;  %v143_v16 = vld [vmem:[%s2157_s1] sm:$0x3]  ;;  %v1764_v25 = vmov 28   ;;  %s1765_s23 = smov 32   ;;  %vm263_vm8 = vcmask 254976   ;;  %vm498_vm9 = vcmask 259076  }
   0x8   :  { %v1345_v17 = vld [vmem:[%s2161_s5] ss:$0 sm:$0xff]  ;;  %1637 = vset.pattern.permute.xlu1 %v1764_v25  ;;  %s1766_s5 = smov 64   ;;  %vm380_vm10 = vcmask 257026   ;;  %vm616_vm11 = vcmask 261126   ;;  %s1770_s0 = smov [#allocation5]  }
   0x9   :  { %1561 = vmatpush3.bf16.msk.msra.mxu0 %vm1557_vm3, %v1556_v9  ;;  %1567 = vmatpush3.bf16.msra.mxu1 %v1868_v13  ;;  %v144_v27 = vld [vmem:[%s2158_s2] sm:$0x3]  ;;  %s1331_s1 = sshll.u32 %s1770_s0, 4  ;;  %s1332_s1 = int_to_ptr.vmem [resolvable:$true] %s1331_s1 }
   0xa   :  { %1568 = vmatprep.subr.bf16.mxu0 %v1760_v4  ;;  %1574 = vmatprep.subr.bf16.mxu1 %v1760_v4 }
   0xc   :  { %1440 = vmatmul.mubr.msk.f32.vlgmr.msra.gmra.mrb[0].mxu0 %vm57_vm1, %v1877_v15  ;;  %1451 = vmatmul.mubr.msk.f32.vlgmr.msra.gmra.mrb[0].mxu1 %vm145_vm5, %v143_v16 }
   0xd   :  { %1570 = vmatpush3.bf16.msra.mxu0 %v1855_v8  ;;  %1461 = vmatprep.mubr.msk.f32.mxu0 %vm1762_vm4, %v1763_v14 }
   0xe   :  { %1571 = vmatprep.subr.bf16.mxu0 %v1760_v4  ;;  %1576 = vmatpush3.bf16.msra.mxu1 %v1855_v8 }
   0xf   :  { %1577 = vmatprep.subr.bf16.mxu1 %v1760_v4  ;;  %1472 = vmatprep.mubr.msk.f32.mxu1 %vm1762_vm4, %v1763_v14 }
  0x11   :  { %1573 = vmatpush3.bf16.msra.mxu0 %v1868_v13 }
  0x12   :  { %1579 = vmatpush3.bf16.msra.mxu1 %v1868_v13  ;;  %1580 = vmatprep.subr.bf16.mxu0 %v1760_v4 }
  0x13   :  { %1586 = vmatprep.subr.bf16.mxu1 %v1760_v4 }
  0xdf   :  { %v1441_v18 = vpop.f32.mrb[0].mxu0  ;;  %v215_v19 = vpop.f32.mrb[0].mxu1 }
  0xe0   :  { %v1902_v20 = vadd.f32 %v1441_v18, %v1345_v17  ;;  %v134_v21 = vpop.f32.mrb[1].mxu0  ;;  %v1452_v22 = vpop.f32.mrb[1].mxu1 }
  0xe1   :  { %v1904_v23 = vadd.f32 %v1345_v17, %v134_v21 }
  0xe3   :  { %v219_v24 = vadd.f32 %v215_v19, %v1904_v23 }
  0xe5   :  { %1640 = vtanh.f32 %v219_v24  ;;  %v1350_v28 = vmul.f32 -1.442695, %v219_v24 }
  0xe7   :  { %1642 = vpow2.f32 %v1350_v28 }
  0xef   :  { %v1641_v26 = vpop.eup %1640 }
  0xf0   :  { %233 = vrot.lane.b32.xlu0 %v1641_v26, %s1765_s23 }
  0xf1   :  { %v1643_v29 = vpop.eup %1642 }
  0xf2   :  { %v223_v30 = vadd.f32 1.0, %v1643_v29 }
  0xf4   :  { %228 = vrot.lane.b32.xlu0 %v144_v27, %s1765_s23  ;;  %1644 = vrcp.f32 %v223_v30 }
  0xfe   :  { %v1645_v31 = vpop.eup %1644 }
 0x162   :  { %v234_v32 = vpop.permute.xlu0 %233 }
 0x163   :  { %v236_v33 = vmul.f32 %v1645_v31, %v234_v32 }
 0x165   :  { %238 = vrot.lane.b32.xlu1 %v236_v33, %s1765_s23 }
 0x166   :  { %v229_v34 = vpop.permute.xlu0 %228 }
 0x167   :  { %v231_v35 = vmul.f32 %v1645_v31, %v229_v34 }
 0x169   :  { %249 = vperm.xlu1 %1637, %v40_v10  }
 0x16d   :  { %253 = vrot.lane.b32.xlu1 %v143_v16, %s1766_s5 }
 0x1d7   :  { %v239_v36 = vpop.permute.xlu1 %238 }
 0x1d8   :  { %v241_v37 = vadd.f32 %v239_v36, %v231_v35 }
 0x1da   :  { %1646 = vtanh.f32 %v241_v37 }
 0x1e4   :  { %v1647_v38 = vpop.eup %1646 }
 0x1e5   :  { %244 = vrot.lane.b32.xlu0 %v1647_v38, %s1765_s23 }
 0x1e8   :  { %v1915_v39 = vpop.permute.xlu1 %249 }
 0x1e9   :  { %vm252_vm6 = vcmp.eq.f32.partialorder %v1915_v39, 1.0  ;;  %v1090_v39 = vld [vmem:[%s2162_s6 + $0x10] sm:$0xff] }
 0x1ea   :  { %v257_v56 = vsel %vm252_vm6, %v241_v37, %v229_v34 }
 0x1eb   :  { %v352_v57 = vrot.slane %v257_v56, 6 }
 0x1ec   :  { %v254_v41 = vpop.permute.xlu1 %253 }
 0x257   :  { %v245_v40 = vpop.permute.xlu0 %244 }
 0x258   :  { %v1917_v42 = vmul.f32 %v1645_v31, %v245_v40 }
 0x25a   :  { %v256_v43 = vsel %vm252_vm6, %v1917_v42, %v254_v41 }
 0x25b   :  { %266 = vrot.lane.b32.xlu0 %v256_v43, %s1766_s5  ;;  %v371_v63 = vrot.slane %v256_v43, 6 }
 0x2cd   :  { %v267_v44 = vpop.permute.xlu0 %266 }
 0x2ce   :  { %1462 = vmatmul.mubr.msk.f32.vlgmr.msra.gmra.mrb[2].mxu0 %vm145_vm5, %v267_v44 }
 0x2cf   :  { %1582 = vmatpush3.bf16.msra.mxu0 %v1855_v8  ;;  %1483 = vmatprep.mubr.msk.f32.mxu0 %vm1762_vm4, %v1763_v14 }
 0x2d0   :  { %1583 = vmatprep.subr.bf16.mxu0 %v1760_v4 }
 0x2d3   :  { %1585 = vmatpush3.bf16.msra.mxu0 %v1868_v13 }
 0x2d4   :  { %1592 = vmatprep.subr.bf16.mxu0 %v1760_v4 }
 0x3a1   :  { %v336_v45 = vpop.f32.mrb[2].mxu0 }
 0x3a2   :  { %v341_v46 = vrot.slane %v336_v45, 6  ;;  %v1463_v47 = vpop.f32.mrb[3].mxu0 }
 0x3a4   :  { %v343_v48 = vadd.f32 %v341_v46, %v1904_v23 }
 0x3a6   :  { %1648 = vtanh.f32 %v343_v48  ;;  %v1352_v50 = vmul.f32 -1.442695, %v343_v48 }
 0x3a8   :  { %1650 = vpow2.f32 %v1352_v50 }
 0x3b0   :  { %v1649_v49 = vpop.eup %1648 }
 0x3b1   :  { %356 = vrot.lane.b32.xlu1 %v1649_v49, %s1765_s23 }
 0x3b2   :  { %v1651_v51 = vpop.eup %1650 }
 0x3b3   :  { %v347_v52 = vadd.f32 1.0, %v1651_v51 }
 0x3b5   :  { %1652 = vrcp.f32 %v347_v52 }
 0x3bf   :  { %v1653_v53 = vpop.eup %1652 }
 0x3c0   :  { %v354_v58 = vmul.f32 %v1653_v53, %v352_v57 }
 0x423   :  { %v357_v54 = vpop.permute.xlu1 %356 }
 0x424   :  { %v359_v55 = vmul.f32 %v1653_v53, %v357_v54 }
 0x426   :  { %361 = vrot.lane.b32.xlu0 %v359_v55, %s1765_s23 }
 0x498   :  { %v362_v59 = vpop.permute.xlu0 %361 }
 0x499   :  { %v364_v60 = vadd.f32 %v362_v59, %v354_v58 }
 0x49b   :  { %1654 = vtanh.f32 %v364_v60  ;;  %v374_v21 = vsel %vm252_vm6, %v364_v60, %v352_v57 }
 0x49c   :  { %v470_v22 = vrot.slane %v374_v21, 6 }
 0x4a5   :  { %v1655_v61 = vpop.eup %1654 }
 0x4a6   :  { %367 = vrot.lane.b32.xlu1 %v1655_v61, %s1765_s23 }
 0x518   :  { %v368_v62 = vpop.permute.xlu1 %367 }
 0x519   :  { %v1937_v0 = vmul.f32 %v1653_v53, %v368_v62 }
 0x51b   :  { %v373_v1 = vsel %vm252_vm6, %v1937_v0, %v371_v63 }
 0x51c   :  { %v383_v2 = vrot.slane %v373_v1, 2  ;;  %v489_v29 = vrot.slane %v373_v1, 6 }
 0x51e   :  { %384 = vrot.lane.b32.xlu0 %v383_v2, %s1766_s5 }
 0x590   :  { %v385_v3 = vpop.permute.xlu0 %384 }
 0x591   :  { %1473 = vmatmul.mubr.msk.f32.vlgmr.msra.gmra.mrb[2].mxu1 %vm145_vm5, %v385_v3 }
 0x592   :  { %1588 = vmatpush3.bf16.msra.mxu1 %v1855_v8  ;;  %1494 = vmatprep.mubr.msk.f32.mxu1 %vm1762_vm4, %v1763_v14 }
 0x593   :  { %1589 = vmatprep.subr.bf16.mxu1 %v1760_v4 }
 0x596   :  { %1591 = vmatpush3.bf16.msra.mxu1 %v1868_v13 }
 0x597   :  { %1598 = vmatprep.subr.bf16.mxu1 %v1760_v4 }
 0x664   :  { %v454_v5 = vpop.f32.mrb[2].mxu1 }
 0x665   :  { %v459_v6 = vrot.slane %v454_v5, 4  ;;  %v1474_v7 = vpop.f32.mrb[3].mxu1 }
 0x667   :  { %v461_v9 = vadd.f32 %v459_v6, %v1904_v23 }
 0x669   :  { %1656 = vtanh.f32 %v461_v9  ;;  %v1354_v11 = vmul.f32 -1.442695, %v461_v9 }
 0x66b   :  { %1658 = vpow2.f32 %v1354_v11 }
 0x673   :  { %v1657_v10 = vpop.eup %1656 }
 0x674   :  { %474 = vrot.lane.b32.xlu1 %v1657_v10, %s1765_s23 }
 0x675   :  { %v1659_v12 = vpop.eup %1658 }
 0x676   :  { %v465_v16 = vadd.f32 1.0, %v1659_v12 }
 0x678   :  { %1660 = vrcp.f32 %v465_v16 }
 0x682   :  { %v1661_v17 = vpop.eup %1660 }
 0x683   :  { %v472_v24 = vmul.f32 %v1661_v17, %v470_v22 }
 0x6e6   :  { %v475_v18 = vpop.permute.xlu1 %474 }
 0x6e7   :  { %v477_v19 = vmul.f32 %v1661_v17, %v475_v18 }
 0x6e9   :  { %479 = vrot.lane.b32.xlu0 %v477_v19, %s1765_s23 }
 0x75b   :  { %v480_v25 = vpop.permute.xlu0 %479 }
 0x75c   :  { %v482_v26 = vadd.f32 %v480_v25, %v472_v24 }
 0x75e   :  { %1662 = vtanh.f32 %v482_v26  ;;  %v492_v47 = vsel %vm252_vm6, %v482_v26, %v470_v22 }
 0x75f   :  { %v588_v48 = vrot.slane %v492_v47, 6 }
 0x768   :  { %v1663_v27 = vpop.eup %1662 }
 0x769   :  { %485 = vrot.lane.b32.xlu1 %v1663_v27, %s1765_s23 }
 0x7db   :  { %v486_v28 = vpop.permute.xlu1 %485 }
 0x7dc   :  { %v1956_v30 = vmul.f32 %v1661_v17, %v486_v28 }
 0x7de   :  { %v491_v31 = vsel %vm252_vm6, %v1956_v30, %v489_v29 }
 0x7df   :  { %v501_v32 = vrot.slane %v491_v31, 4  ;;  %v607_v53 = vrot.slane %v491_v31, 6 }
 0x7e1   :  { %502 = vrot.lane.b32.xlu0 %v501_v32, %s1766_s5 }
 0x853   :  { %v503_v33 = vpop.permute.xlu0 %502 }
 0x854   :  { %1484 = vmatmul.mubr.msk.f32.vlgmr.msra.gmra.mrb[4].mxu0 %vm145_vm5, %v503_v33 }
 0x855   :  { %1594 = vmatpush3.bf16.msra.mxu0 %v1855_v8  ;;  %1505 = vmatprep.mubr.msk.f32.mxu0 %vm1762_vm4, %v1763_v14 }
 0x856   :  { %1595 = vmatprep.subr.bf16.mxu0 %v1760_v4 }
 0x859   :  { %1597 = vmatpush3.bf16.msra.mxu0 %v1868_v13 }
 0x85a   :  { %1604 = vmatprep.subr.bf16.mxu0 %v1760_v4 }
 0x927   :  { %v572_v34 = vpop.f32.mrb[4].mxu0 }
 0x928   :  { %v577_v35 = vrot.slane %v572_v34, 2  ;;  %v1485_v36 = vpop.f32.mrb[5].mxu0 }
 0x92a   :  { %v579_v37 = vadd.f32 %v577_v35, %v1904_v23 }
 0x92c   :  { %1664 = vtanh.f32 %v579_v37  ;;  %v1356_v40 = vmul.f32 -1.442695, %v579_v37 }
 0x92e   :  { %1666 = vpow2.f32 %v1356_v40 }
 0x936   :  { %v1665_v38 = vpop.eup %1664 }
 0x937   :  { %592 = vrot.lane.b32.xlu1 %v1665_v38, %s1765_s23 }
 0x938   :  { %v1667_v41 = vpop.eup %1666 }
 0x939   :  { %v583_v43 = vadd.f32 1.0, %v1667_v41 }
 0x93b   :  { %1668 = vrcp.f32 %v583_v43 }
 0x945   :  { %v1669_v44 = vpop.eup %1668 }
 0x946   :  { %v590_v49 = vmul.f32 %v1669_v44, %v588_v48 }
 0x9a9   :  { %v593_v45 = vpop.permute.xlu1 %592 }
 0x9aa   :  { %v595_v46 = vmul.f32 %v1669_v44, %v593_v45 }
 0x9ac   :  { %597 = vrot.lane.b32.xlu0 %v595_v46, %s1765_s23 }
 0xa1e   :  { %v598_v23 = vpop.permute.xlu0 %597 }
 0xa1f   :  { %v600_v50 = vadd.f32 %v598_v23, %v590_v49 }
 0xa21   :  { %1670 = vtanh.f32 %v600_v50  ;;  %v610_v6 = vsel %vm252_vm6, %v600_v50, %v588_v48 }
 0xa22   :  { %v703_v7 = vrot.slane %v610_v6, 6 }
 0xa2b   :  { %v1671_v51 = vpop.eup %1670 }
 0xa2c   :  { %603 = vrot.lane.b32.xlu1 %v1671_v51, %s1765_s23 }
 0xa9e   :  { %v604_v52 = vpop.permute.xlu1 %603 }
 0xa9f   :  { %v1975_v54 = vmul.f32 %v1669_v44, %v604_v52 }
 0xaa1   :  { %v609_v55 = vsel %vm252_vm6, %v1975_v54, %v607_v53 }
 0xaa2   :  { %v619_v56 = vrot.slane %v609_v55, 6 }
 0xaa4   :  { %620 = vrot.lane.b32.xlu0 %v619_v56, %s1766_s5 }
 0xb16   :  { %v621_v57 = vpop.permute.xlu0 %620 }
 0xb17   :  { %1495 = vmatmul.mubr.msk.f32.vlgmr.msra.gmra.mrb[4].mxu1 %vm145_vm5, %v621_v57 }
 0xb18   :  { %1600 = vmatpush3.bf16.msra.mxu1 %v1855_v8  ;;  %1516 = vmatprep.mubr.msk.f32.mxu1 %vm1762_vm4, %v1763_v14 }
 0xb19   :  { %1601 = vmatprep.subr.bf16.mxu1 %v1760_v4 }
 0xb1c   :  { %1603 = vmatpush3.bf16.msra.mxu1 %v1868_v13 }
 0xbea   :  { %v690_v58 = vpop.f32.mrb[4].mxu1 }
 0xbeb   :  { %v694_v59 = vadd.f32 %v690_v58, %v1902_v20  ;;  %v1496_v60 = vpop.f32.mrb[5].mxu1 }
 0xbed   :  { %1672 = vtanh.f32 %v694_v59  ;;  %v1358_v62 = vmul.f32 -1.442695, %v694_v59 }
 0xbef   :  { %1674 = vpow2.f32 %v1358_v62 }
 0xbf7   :  { %v1673_v61 = vpop.eup %1672 }
 0xbf8   :  { %707 = vrot.lane.b32.xlu1 %v1673_v61, %s1765_s23 }
 0xbf9   :  { %v1675_v63 = vpop.eup %1674 }
 0xbfa   :  { %v698_v1 = vadd.f32 1.0, %v1675_v63 }
 0xbfc   :  { %723 = vperm.xlu1 %1637, %v1877_v15   ;;  %1676 = vrcp.f32 %v698_v1 }
 0xc06   :  { %v1677_v2 = vpop.eup %1676 }
 0xc07   :  { %v705_v9 = vmul.f32 %v1677_v2, %v703_v7 }
 0xc6a   :  { %v708_v3 = vpop.permute.xlu1 %707 }
 0xc6b   :  { %v710_v5 = vmul.f32 %v1677_v2, %v708_v3 }
 0xc6d   :  { %712 = vrot.lane.b32.xlu0 %v710_v5, %s1765_s23 }
 0xc7b   :  { %v1994_v15 = vpop.permute.xlu1 %723 }
 0xc7c   :  { %vm726_vm7 = vcmp.eq.f32.partialorder %v1994_v15, 1.0 }
 0xcdf   :  { %v713_v10 = vpop.permute.xlu0 %712 }
 0xce0   :  { %v715_v11 = vadd.f32 %v713_v10, %v705_v9 }
 0xce2   :  { %1678 = vtanh.f32 %v715_v11 }
 0xcec   :  { %v1679_v12 = vpop.eup %1678 }
 0xced   :  { %718 = vrot.lane.b32.xlu0 %v1679_v12, %s1765_s23 }
 0xd5f   :  { %v719_v16 = vpop.permute.xlu0 %718 }
 0xd60   :  { %v1996_v17 = vmul.f32 %v1677_v2, %v719_v16 }
 0xd62   :  { %v728_v18 = vsel %vm726_vm7, %v1996_v17, %v619_v56 }
 0xd63   :  { %737 = vrot.lane.b32.xlu1 %v728_v18, %s1766_s5  ;;  %v842_v37 = vrot.slane %v728_v18, 6 }
 0xdd5   :  { %v738_v19 = vpop.permute.xlu1 %737 }
 0xdd6   :  { %1506 = vmatmul.mubr.msk.f32.vlgmr.msra.gmra.mrb[6].mxu0 %vm145_vm5, %v738_v19 }
 0xdd7   :  { %1606 = vmatpush3.bf16.msra.mxu0 %v1855_v8  ;;  %1527 = vmatprep.mubr.msk.f32.mxu0 %vm1762_vm4, %v1763_v14 }
 0xdd8   :  { %1607 = vmatprep.subr.bf16.mxu0 %v1760_v4  ;;  %v729_v4 = vsel %vm726_vm7, %v715_v11, %v703_v7 }
 0xddb   :  { %1609 = vmatpush3.bf16.msra.mxu0 %v1868_v13  ;;  %v823_v13 = vrot.slane %v729_v4, 6  ;;  %v375_v4 = vsel %vm252_vm6, %v1937_v0, 0.0  ;;  %v1089_v0 = vld [vmem:[%s2162_s6 + $0x8] sm:$0xff] }
 0xea9   :  { %v807_v21 = vpop.f32.mrb[6].mxu0 }
 0xeaa   :  { %v812_v22 = vrot.slane %v807_v21, 6  ;;  %v1507_v24 = vpop.f32.mrb[7].mxu0 }
 0xeab   :  { %v730_v24 = vsel %vm726_vm7, %v1996_v17, 0.0 }
 0xeac   :  { %v814_v25 = vadd.f32 %v812_v22, %v1902_v20  ;;  %v258_v22 = vsel %vm252_vm6, %v1917_v42, 0.0 }
 0xeae   :  { %1680 = vtanh.f32 %v814_v25  ;;  %v1360_v27 = vmul.f32 -1.442695, %v814_v25 }
 0xeb0   :  { %1682 = vpow2.f32 %v1360_v27 }
 0xeb8   :  { %v1681_v26 = vpop.eup %1680 }
 0xeb9   :  { %827 = vrot.lane.b32.xlu0 %v1681_v26, %s1765_s23 }
 0xeba   :  { %v1683_v28 = vpop.eup %1682 }
 0xebb   :  { %v818_v8 = vadd.f32 1.0, %v1683_v28 }
 0xebd   :  { %1684 = vrcp.f32 %v818_v8 }
 0xec7   :  { %v1685_v29 = vpop.eup %1684 }
 0xec8   :  { %v825_v32 = vmul.f32 %v1685_v29, %v823_v13 }
 0xf2b   :  { %v828_v14 = vpop.permute.xlu0 %827 }
 0xf2c   :  { %v830_v31 = vmul.f32 %v1685_v29, %v828_v14 }
 0xf2e   :  { %832 = vrot.lane.b32.xlu1 %v830_v31, %s1765_s23 }
 0xfa0   :  { %v833_v33 = vpop.permute.xlu1 %832 }
 0xfa1   :  { %v835_v34 = vadd.f32 %v833_v33, %v825_v32  ;;  %v1088_v33 = vld [vmem:[%s2162_s6] sm:$0xff] }
 0xfa3   :  { %1686 = vtanh.f32 %v835_v34  ;;  %v845_v55 = vsel %vm726_vm7, %v835_v34, %v823_v13  ;;  %v611_v13 = vsel %vm252_vm6, %v1975_v54, 0.0  ;;  %v1610_v34 = vpack.c.bf16 %v1089_v0, %v1088_v33  ;;  %v1091_v54 = vld [vmem:[%s2162_s6 + $0x18] sm:$0xff] }
 0xfa4   :  { %v940_v56 = vrot.slane %v845_v55, 6  ;;  %v1767_v55 = vmov 32  }
 0xfa5   :  { %1611 = vmatprep.subr.bf16.mxu1 %v1610_v34  ;;  %1639 = vset.pattern.permute.xlu0 %v1767_v55 }
 0xfa6   :  { %1638 = vset.pattern.permute.xlu1 %v1767_v55 }
 0xfad   :  { %v1687_v35 = vpop.eup %1686 }
 0xfae   :  { %838 = vrot.lane.b32.xlu0 %v1687_v35, %s1765_s23  ;;  %v1614_v35 = vpack.c.bf16 %v1091_v54, %v1090_v39 }
0x1020   :  { %v839_v36 = vpop.permute.xlu0 %838 }
0x1021   :  { %v2015_v38 = vmul.f32 %v1685_v29, %v839_v36  ;;  %v1194_v36 = vld [vmem:[%s2164_s8] sm:$0xff] }
0x1023   :  { %v844_v40 = vsel %vm726_vm7, %v2015_v38, %v842_v37  ;;  %v846_v32 = vsel %vm726_vm7, %v2015_v38, 0.0  ;;  %v1195_v37 = vld [vmem:[%s2164_s8 + $0x8] sm:$0xff] }
0x1024   :  { %v853_v41 = vrot.slane %v844_v40, 2  ;;  %v959_v62 = vrot.slane %v844_v40, 6  ;;  %v1618_v40 = vpack.c.bf16 %v1195_v37, %v1194_v36 }
0x1026   :  { %854 = vrot.lane.b32.xlu1 %v853_v41, %s1766_s5  ;;  %1619 = vmatprep.subr.bf16.mxu0 %v1618_v40 }
0x1098   :  { %v855_v43 = vpop.permute.xlu1 %854 }
0x1099   :  { %1517 = vmatmul.mubr.msk.f32.vlgmr.msra.gmra.mrb[6].mxu1 %vm145_vm5, %v855_v43 }
0x109a   :  { %1613 = vmatpush3.bf16.msra.mxu1 %v1610_v34 }
0x109b   :  { %1615 = vmatprep.subr.bf16.mxu1 %v1614_v35 }
0x109e   :  { %1617 = vmatpush3.bf16.msra.mxu1 %v1614_v35 }
0x116c   :  { %v924_v44 = vpop.f32.mrb[6].mxu1 }
0x116d   :  { %v929_v45 = vrot.slane %v924_v44, 4  ;;  %v1518_v46 = vpop.f32.mrb[7].mxu1 }
0x116f   :  { %v931_v47 = vadd.f32 %v929_v45, %v1902_v20 }
0x1171   :  { %1688 = vtanh.f32 %v931_v47  ;;  %v1362_v49 = vmul.f32 -1.442695, %v931_v47 }
0x1173   :  { %1690 = vpow2.f32 %v1362_v49 }
0x117b   :  { %v1689_v48 = vpop.eup %1688 }
0x117c   :  { %944 = vrot.lane.b32.xlu0 %v1689_v48, %s1765_s23 }
0x117d   :  { %v1691_v23 = vpop.eup %1690 }
0x117e   :  { %v935_v50 = vadd.f32 1.0, %v1691_v23 }
0x1180   :  { %1692 = vrcp.f32 %v935_v50 }
0x118a   :  { %v1693_v51 = vpop.eup %1692 }
0x118b   :  { %v942_v57 = vmul.f32 %v1693_v51, %v940_v56 }
0x11ee   :  { %v945_v52 = vpop.permute.xlu0 %944 }
0x11ef   :  { %v947_v53 = vmul.f32 %v1693_v51, %v945_v52  ;;  %v1197_v52 = vld [vmem:[%s2164_s8 + $0x18] sm:$0xff] }
0x11f1   :  { %949 = vrot.lane.b32.xlu1 %v947_v53, %s1765_s23 }
0x1263   :  { %v950_v58 = vpop.permute.xlu1 %949 }
0x1264   :  { %v952_v59 = vadd.f32 %v950_v58, %v942_v57 }
0x1266   :  { %1694 = vtanh.f32 %v952_v59  ;;  %v2055_v42 = vsel %vm726_vm7, %v952_v59, %v940_v56  ;;  %v1365_v56 = vld [vmem:[%s2163_s7] ss:$0 sm:$0xff]  ;;  %s1768_s7 = smov 96  }
0x1267   :  { %v1057_v26 = vrot.slane %v2055_v42, 6 }
0x1270   :  { %v1695_v60 = vpop.eup %1694 }
0x1271   :  { %955 = vrot.lane.b32.xlu0 %v1695_v60, %s1765_s23 }
0x12e3   :  { %v956_v61 = vpop.permute.xlu0 %955 }
0x12e4   :  { %v958_v63 = vmul.f32 %v1693_v51, %v956_v61  ;;  %v1196_v51 = vld [vmem:[%s2164_s8 + $0x10] sm:$0xff]  ;;  %s1769_s8 = smov [#allocation3]  }
0x12e5   :  { %v1622_v53 = vpack.c.bf16 %v1197_v52, %v1196_v51  ;;  %s1321_s22 = sshll.u32 %s1769_s8, 4  ;;  %s1322_s22 = int_to_ptr.vmem [resolvable:$true] %s1321_s22 }
0x12e6   :  { %v2030_v1 = vsel %vm726_vm7, %v958_v63, %v959_v62  ;;  %v963_v25 = vsel %vm726_vm7, %v958_v63, 0.0  ;;  %p1717_p1 = scmp.lt.s32.totalorder %s1322_s22, %s1322_s22 }
0x12e7   :  { %v970_v2 = vrot.slane %v2030_v1, 4  ;;  %v1076_v41 = vrot.slane %v2030_v1, 6 }
0x12e9   :  { %971 = vrot.lane.b32.xlu1 %v970_v2, %s1766_s5 }
0x135b   :  { %v972_v3 = vpop.permute.xlu1 %971 }
0x135c   :  { %1528 = vmatmul.mubr.msk.f32.vlgmr.msra.gmra.mrb[8].mxu0 %vm145_vm5, %v972_v3 }
0x135d   :  { %1621 = vmatpush3.bf16.msra.mxu0 %v1618_v40 }
0x135e   :  { %1623 = vmatprep.subr.bf16.mxu0 %v1622_v53 }
0x1361   :  { %1625 = vmatpush3.bf16.msra.mxu0 %v1622_v53 }
0x142f   :  { %v1041_v5 = vpop.f32.mrb[8].mxu0 }
0x1430   :  { %v1046_v6 = vrot.slane %v1041_v5, 2  ;;  %v1529_v7 = vpop.f32.mrb[9].mxu0 }
0x1432   :  { %v1048_v9 = vadd.f32 %v1046_v6, %v1902_v20  ;;  %v493_v20 = vsel %vm252_vm6, %v1956_v30, 0.0 }
0x1434   :  { %1696 = vtanh.f32 %v1048_v9  ;;  %v1364_v11 = vmul.f32 -1.442695, %v1048_v9 }
0x1436   :  { %1698 = vpow2.f32 %v1364_v11 }
0x143e   :  { %v1697_v10 = vpop.eup %1696 }
0x143f   :  { %1061 = vrot.lane.b32.xlu0 %v1697_v10, %s1765_s23 }
0x1440   :  { %v1699_v12 = vpop.eup %1698 }
0x1441   :  { %v1052_v16 = vadd.f32 1.0, %v1699_v12 }
0x1443   :  { %1700 = vrcp.f32 %v1052_v16 }
0x144d   :  { %v1701_v18 = vpop.eup %1700 }
0x144e   :  { %v1059_v30 = vmul.f32 %v1701_v18, %v1057_v26 }
0x14b1   :  { %v1062_v19 = vpop.permute.xlu0 %1061 }
0x14b2   :  { %v1064_v21 = vmul.f32 %v1701_v18, %v1062_v19 }
0x14b4   :  { %1066 = vrot.lane.b32.xlu1 %v1064_v21, %s1765_s23 }
0x14b8   :  { %260 = vrot.lane.b32.xlu1 %v258_v22, %s1766_s5 }
0x14bc   :  { %495 = vrot.lane.b32.xlu1 %v493_v20, %s1766_s5 }
0x14c0   :  { %732 = vrot.lane.b32.xlu1 %v730_v24, %s1766_s5 }
0x14c4   :  { %965 = vrot.lane.b32.xlu1 %v963_v25, %s1766_s5 }
0x1526   :  { %v1067_v27 = vpop.permute.xlu1 %1066 }
0x1527   :  { %v2060_v28 = vadd.f32 %v1067_v27, %v1059_v30 }
0x1529   :  { %1702 = vtanh.f32 %v2060_v28  ;;  %v1079_v10 = vsel %vm726_vm7, %v2060_v28, %v1057_v26 }
0x152a   :  { %v261_v17 = vpop.permute.xlu1 %260 }
0x152b   :  { %264 = vst.msk [vmem:[#allocation2] sm:$0x3] %vm263_vm8, %v261_v17 }
0x152e   :  { %v496_v8 = vpop.permute.xlu1 %495 }
0x152f   :  { %499 = vst.msk [vmem:[#allocation2] sm:$0x30] %vm498_vm9, %v496_v8 }
0x1532   :  { %v733_v29 = vpop.permute.xlu1 %732 }
0x1533   :  { %v1703_v14 = vpop.eup %1702  ;;  %735 = vst.msk [vmem:[#allocation2 + $0x8] sm:$0x3] %vm263_vm8, %v733_v29 }
0x1534   :  { %1072 = vrot.lane.b32.xlu0 %v1703_v14, %s1765_s23  ;;  %s1712_s23 = scalar_lea.vmem %s1322_s22, 32 }
0x1535   :  { %p1713_p0 = scmp.ne.s32.totalorder %s1322_s22, %s1712_s23  ;;  %p1718_p2 = scmp.lt.s32.totalorder %s1712_s23, %s1712_s23 }
0x1536   :  { %v966_v31 = vpop.permute.xlu1 %965 }
0x1537   :  { %968 = vst.msk [vmem:[#allocation2 + $0x8] sm:$0x30] %vm498_vm9, %v966_v31  ;;  %p1719_p3 = por %p1718_p2, %p1717_p1 }
0x1538   :  { %377 = vrot.lane.b32.xlu0 %v375_v4, %s1766_s5 }
0x1539   :  { %p1720_p4 = pnand %p1719_p3, %p1713_p0 }
0x153c   :  { %613 = vrot.lane.b32.xlu0 %v611_v13, %s1766_s5 }
0x1540   :  { %848 = vrot.lane.b32.xlu0 %v846_v32, %s1766_s5 }
0x15a6   :  { %v1073_v38 = vpop.permute.xlu0 %1072 }
0x15a7   :  { %v1075_v43 = vmul.f32 %v1701_v18, %v1073_v38 }
0x15a9   :  { %v1080_v44 = vsel %vm726_vm7, %v1075_v43, 0.0  ;;  %v1078_v45 = vsel %vm726_vm7, %v1075_v43, %v1076_v41 }
0x15aa   :  { %1082 = vrot.lane.b32.xlu0 %v1080_v44, %s1766_s5  ;;  %v378_v46 = vpop.permute.xlu0 %377 }
0x15ab   :  { %381 = vst.msk [vmem:[#allocation2] sm:$0xc] %vm380_vm10, %v378_v46 }
0x15ae   :  { %v614_v47 = vpop.permute.xlu0 %613 }
0x15af   :  { %617 = vst.msk [vmem:[#allocation2] sm:$0xc0] %vm616_vm11, %v614_v47 }
0x15b2   :  { %v849_v48 = vpop.permute.xlu0 %848 }
0x15b3   :  { %851 = vst.msk [vmem:[#allocation2 + $0x8] sm:$0xc] %vm380_vm10, %v849_v48 }
0x15b6   :  { %v1086_v49 = vld [vmem:[#allocation2] sm:$0xff] }
0x15b7   :  { %1538 = vmatprep.mubr.msk.f32.mxu1 %vm145_vm5, %v1086_v49 }
0x161c   :  { %v1083_v23 = vpop.permute.xlu0 %1082 }
0x161d   :  { %1085 = vst.msk [vmem:[#allocation2 + $0x8] sm:$0xc0] %vm616_vm11, %v1083_v23 }
0x1624   :  { %v1087_v50 = vld [vmem:[#allocation2 + $0x8] sm:$0xff] }
0x1625   :  { %1539 = vmatmul.mubr.msk.f32.vlgmr.msra.gmra.mrb[8].mxu1 %vm145_vm5, %v1087_v50 }
0x16f8   :  { %v1540_v57 = vpop.f32.mrb[8].mxu1 }
0x16f9   :  { %v1177_v58 = vadd.f32 %v1540_v57, %v1365_v56  ;;  %v1171_v59 = vpop.f32.mrb[9].mxu1 }
0x16fa   :  { %v1172_v60 = vadd.f32 %v1365_v56, %v1171_v59 }
0x16fb   :  { %v1369_v61 = vmul.f32 -1.442695, %v1177_v58  ;;  %v1181_v1 = vmax.f32 %v1177_v58, 0.0 }
0x16fc   :  { %v1180_v62 = vmax.f32 %v1172_v60, 0.0  ;;  %v1368_v63 = vmul.f32 -1.442695, %v1172_v60 }
0x16fd   :  { %1704 = vpow2.f32 %v1369_v61 }
0x16fe   :  { %1706 = vpow2.f32 %v1368_v63  ;;  %1549 = vmatprep.mubr.msk.f32.mxu0 %vm145_vm5, %v1180_v62 }
0x16ff   :  { %1550 = vmatmul.mubr.msk.f32.vlgmr.msra.gmra.mrb[10].mxu0 %vm145_vm5, %v1181_v1 }
0x1707   :  { %v1705_v2 = vpop.eup %1704 }
0x1708   :  { %v1707_v3 = vpop.eup %1706  ;;  %v1189_v5 = vadd.f32 1.0, %v1705_v2 }
0x1709   :  { %v1188_v6 = vadd.f32 1.0, %v1707_v3 }
0x170a   :  { %1708 = vrcp.f32 %v1189_v5 }
0x170b   :  { %1710 = vrcp.f32 %v1188_v6 }
0x1714   :  { %v1709_v7 = vpop.eup %1708 }
0x1715   :  { %v1711_v9 = vpop.eup %1710  ;;  %1295 = vperm.xlu0 %1639, %v1709_v7  }
0x1716   :  { %1290 = vperm.xlu1 %1638, %v1711_v9  }
0x171a   :  { %1304 = vrot.lane.b32.xlu1 %v1078_v45, %s1766_s5 }
0x171e   :  { %1309 = vrot.lane.b32.xlu1 %v1079_v10, %s1768_s7 }
0x1795   :  { %v1291_v11 = vpop.permute.xlu1 %1290 }
0x1799   :  { %v1305_v12 = vpop.permute.xlu1 %1304 }
0x179a   :  { %1307 = vst.msk [vmem:[#allocation3 - $0x6] sm:$0xc0] %vm616_vm11, %v1305_v12 }
0x179b   :  { %1723 = shalt.err (!%p1720_p4)
}
0x179c   :  { %s1724_s5 = scalar_lea.hbm %s2167_s11, 32 }
0x179d   :  { %p1725_p5 = scmp.ne.s32.totalorder %s2167_s11, %s1724_s5  ;;  %p1728_p6 = scmp.lt.u32.totalorder %s1724_s5, %s2167_s11 }
0x179f   :  { %p1730_p7 = pnand %p1728_p6, %p1725_p5 }
0x17a1   :  { %1733 = shalt.err (!%p1730_p7)
}
0x17a2   :  { %1324 = dma.vmem_to_hbm [thread:$0]  %s1322_s22, 32, %s2167_s11, [#allocation4]   ;;  %v1310_v15 = vpop.permute.xlu1 %1309 }
0x17a3   :  { %1312 = vst.msk [vmem:[#allocation5 - $0x6] sm:$0xc0] %vm616_vm11, %v1310_v15  ;;  %s1734_s13 = scalar_lea.vmem %s1332_s1, 32  ;;  %p1739_p9 = scmp.lt.s32.totalorder %s1332_s1, %s1332_s1 }
0x17a4   :  { %p1735_p8 = scmp.ne.s32.totalorder %s1332_s1, %s1734_s13  ;;  %p1740_p10 = scmp.lt.s32.totalorder %s1734_s13, %s1734_s13 }
0x17a6   :  { %p1741_p11 = por %p1740_p10, %p1739_p9 }
0x17a8   :  { %p1742_p12 = pnand %p1741_p11, %p1735_p8 }
0x17aa   :  { %1745 = shalt.err (!%p1742_p12)
}
0x17ab   :  { %s1746_s16 = scalar_lea.hbm %s2168_s12, 32 }
0x17ac   :  { %p1747_p13 = scmp.ne.s32.totalorder %s2168_s12, %s1746_s16  ;;  %p1750_p0 = scmp.lt.u32.totalorder %s1746_s16, %s2168_s12 }
0x17ae   :  { %p1752_p1 = pnand %p1750_p0, %p1747_p13 }
0x17b0   :  { %1755 = shalt.err (!%p1752_p1)
}
0x17b1   :  { %1334 = dma.vmem_to_hbm [thread:$0]  %s1332_s1, 32, %s2168_s12, [#allocation6]   ;;  %v1286_v16 = vlaneseq  ;;  %v1370_v19 = vld [vmem:[%s2165_s9] ss:$0 sm:$0xff]  ;;  %v1296_v24 = vpop.permute.xlu0 %1295 }
0x17b3   :  { %v1287_v18 = vand.u32 127, %v1286_v16 }
0x17b5   :  { %vm1298_vm12 = vcmp.eq.s32.totalorder %v1287_v18, 2 }
0x17d2   :  { %v1551_v21 = vpop.f32.mrb[10].mxu0 }
0x17d3   :  { %v1283_v22 = vadd.f32 %v1551_v21, %v1370_v19  ;;  %v1277_v20 = vpop.f32.mrb[11].mxu0 }
0x17d4   :  { %v1278_v25 = vadd.f32 %v1370_v19, %v1277_v20 }
0x17d5   :  { %v1300_v42 = vsel %vm1298_vm12, %v1296_v24, %v1283_v22 }
0x17d6   :  { %1302 = vst [vmem:[%s2166_s10 + $0x8] sm:$0xff] %v1300_v42  ;;  %v1299_v26 = vsel %vm1298_vm12, %v1291_v11, %v1278_v25 }
0x17d7   :  { %1301 = vst [vmem:[%s2166_s10] sm:$0xff] %v1299_v26 }
0x17d8   :  { %1756 = dma.done.wait [#allocation4], 32  }
0x17d9   :  { %1757 = vsyncadd [#allocation4], 4294967264 }
0x17da   :  { %1758 = dma.done.wait [#allocation6], 32  }
0x17db   :  { %1759 = vsyncadd [#allocation6], 4294967264 }
0x17dc   :  { %1343 = vsyncpa [#allocation4], 1 }
0x17dd   :  { %1344 = vsyncpa [#allocation6], 1 }

</bundles_post_ra>
